<compile_context>
chip_gen: v6e
topology: v6e:2x2x1
jax: 0.10.0
libtpu: 0.0.40
codegen_flags: <defaults>
</compile_context>

<pallas_src>
import functools

import jax
import jax.numpy as jnp
from jax.experimental import pallas as pl
from jax.experimental.pallas import tpu as pltpu


# ----------------------------- Pallas kernels ------------------------------ #

def _stage_gap_kernel(hw_total, x_ref, w_ref, shift_ref, pooled_ref, acc_ref):
    """with_cam=False: stage (1x1 conv, BN scale pre-folded) + shift + ReLU -> GAP.

    x_ref:      (1, Cin, THW)  compute dtype, HW on lanes (NCHW layout)
    w_ref:      (Cf, Cin)      compute dtype, BN scale folded in
    shift_ref:  (Cf, 1)        f32 BN shift (per-sublane broadcast)
    pooled_ref: (1, Cf, 1)     f32 output (GAP of stage features)
    acc_ref:    (Cf, 1)        f32 scratch accumulator
    """
    t = pl.program_id(1)

    @pl.when(t == 0)
    def _():
        acc_ref[...] = jnp.zeros_like(acc_ref)

    x = x_ref[0]                                                     # (Cin, THW)
    y = jnp.dot(w_ref[...], x, preferred_element_type=jnp.float32)   # MXU, f32 acc
    y = jnp.maximum(y + shift_ref[...], 0.0)                         # BN shift + ReLU
    acc_ref[...] += jnp.sum(y, axis=1, keepdims=True)                # lane reduce (XLU)

    @pl.when(t == pl.num_programs(1) - 1)
    def _():
        pooled_ref[0] = (acc_ref[...] * (1.0 / hw_total)).astype(pooled_ref.dtype)


def _stage_cam_kernel(hw_total, x_ref, w_ref, shift_ref, cls_ref,
                      feat_ref, logit_ref, acc_ref):
    """with_cam=True: stage -> classifier (CAM, natively lane-dense) -> GAP(CAM).

    cls_ref:   (Kp, Cf)      compute dtype (classes zero-padded to a multiple of 8)
    feat_ref:  (1, Kp, THW)  f32 output CAM block, already in NCHW layout
    logit_ref: (1, Kp, 1)    f32 output logits
    acc_ref:   (Kp, 1)       f32 scratch accumulator
    """
    t = pl.program_id(1)

    @pl.when(t == 0)
    def _():
        acc_ref[...] = jnp.zeros_like(acc_ref)

    x = x_ref[0]                                                     # (Cin, THW)
    y = jnp.dot(w_ref[...], x, preferred_element_type=jnp.float32)   # (Cf, THW)
    y = jnp.maximum(y + shift_ref[...], 0.0)
    f = jnp.dot(cls_ref[...], y.astype(cls_ref.dtype),
                preferred_element_type=jnp.float32)                  # (Kp, THW)

    feat_ref[0] = f.astype(feat_ref.dtype)                           # lane-dense store
    acc_ref[...] += jnp.sum(f, axis=1, keepdims=True)                # (Kp, 1)

    @pl.when(t == pl.num_programs(1) - 1)
    def _():
        logit_ref[0] = (acc_ref[...] * (1.0 / hw_total)).astype(logit_ref.dtype)


# ------------------------------ Pallas wrapper ------------------------------ #

def _pick_hw_tile(hw, target=512):
    """Largest 128-multiple divisor of hw that is <= target, else hw itself."""
    if hw <= target:
        return hw
    for cand in range(target - target % 128, 127, -128):
        if hw % cand == 0:
            return cand
    # TODO(synk): pad HW and mask the remainder in-kernel instead of falling
    #             back to a single full tile for awkward (prime-ish) HW sizes.
    return hw


def classifier_forward(x_nchw, params, with_cam=False, hw_tile=None,
                       compute_dtype=jnp.bfloat16, hw_tile_target=512):
    """Semantics of Classifier.forward (PyTorch NCHW input)."""
    N, Cin, H, W = x_nchw.shape
    HW = H * W
    K = params["num_classes"]

    # NCHW consumed directly: only a (free) reshape, no HBM transpose pass.
    x = x_nchw.reshape(N, Cin, HW).astype(compute_dtype)

    # Fold BN scale into the stage weight (exact, done once outside the kernel).
    w_k = (params["stage_w"] * params["bn_scale"][None, :]).T.astype(compute_dtype)  # (Cf, Cin)
    shift = params["bn_shift"].reshape(-1, 1).astype(jnp.float32)                    # (Cf, 1)
    Cf = w_k.shape[0]

    thw = _pick_hw_tile(HW, hw_tile_target) if hw_tile is None else hw_tile
    assert HW % thw == 0, "HW must be divisible by the HW tile"
    assert thw % 128 == 0 or thw == HW, "HW tile must be lane-aligned or full"
    n_t = HW // thw

    itemsize = jnp.dtype(compute_dtype).itemsize
    base_bytes = N * Cin * HW * itemsize + Cf * Cin * itemsize + Cf * 4

    # TODO(synk): mark the grid-invariant weight specs pipeline_mode=pl.Buffered(1)
    #             if the double-buffered copy of the stage weight ever pressures
    #             VMEM; with bf16 weights the plan below fits the scoped limit.
    x_spec = pl.BlockSpec((1, Cin, thw), lambda n, t: (n, 0, t))
    w_spec = pl.BlockSpec((Cf, Cin), lambda n, t: (0, 0))
    s_spec = pl.BlockSpec((Cf, 1), lambda n, t: (0, 0))

    # TODO(synk): for N == 1 on v7x (2 TensorCores) split the HW reduction into an
    #             outer parallel axis of 2 with partial accumulators combined here.
    cparams = pltpu.CompilerParams(
        dimension_semantics=("parallel", "arbitrary"),
        vmem_limit_bytes=48 * 1024 * 1024,
    )

    if with_cam:
        cls_w = params["cls_w"].astype(compute_dtype)                 # (K, Cf)
        Kp = -(-K // 8) * 8                                           # sublane-aligned
        cls_w_pad = jnp.zeros((Kp, Cf), compute_dtype).at[:K, :].set(cls_w)

        cost = pl.CostEstimate(
            flops=int(2 * N * HW * Cin * Cf + 2 * N * HW * Cf * Kp),
            transcendentals=0,
            bytes_accessed=int(base_bytes + Kp * Cf * itemsize
                               + N * Kp * HW * 4 + N * Kp * 4),
        )
        feat, logit = pl.pallas_call(
            functools.partial(_stage_cam_kernel, HW),
            out_shape=(
                jax.ShapeDtypeStruct((N, Kp, HW), jnp.float32),
                jax.ShapeDtypeStruct((N, Kp, 1), jnp.float32),
            ),
            grid=(N, n_t),
            in_specs=[x_spec, w_spec, s_spec,
                      pl.BlockSpec((Kp, Cf), lambda n, t: (0, 0))],
            out_specs=(
                pl.BlockSpec((1, Kp, thw), lambda n, t: (n, 0, t)),
                pl.BlockSpec((1, Kp, 1), lambda n, t: (n, 0, 0)),
            ),
            scratch_shapes=[pltpu.VMEM((Kp, 1), jnp.float32)],
            compiler_params=cparams,
            cost_estimate=cost,
        )(x, w_k, shift, cls_w_pad)
        features = feat[:, :K, :].reshape(N, K, H, W)   # (N, K, HW) == NCHW layout
        logits = logit[:, :K, 0]
        return logits, features
    else:
        cost = pl.CostEstimate(
            flops=int(2 * N * HW * Cin * Cf),
            transcendentals=0,
            bytes_accessed=int(base_bytes + N * Cf * 4),
        )
        pooled = pl.pallas_call(
            functools.partial(_stage_gap_kernel, HW),
            out_shape=jax.ShapeDtypeStruct((N, Cf, 1), jnp.float32),
            grid=(N, n_t),
            in_specs=[x_spec, w_spec, s_spec],
            out_specs=pl.BlockSpec((1, Cf, 1), lambda n, t: (n, 0, 0)),
            scratch_shapes=[pltpu.VMEM((Cf, 1), jnp.float32)],
            compiler_params=cparams,
            cost_estimate=cost,
        )(x, w_k, shift)
        # Tiny (N, Cf) @ (Cf, K) head matmul in plain JAX: keeps the classifier
        # weight out of the pipeline and matches GAP-then-1x1-conv of the module.
        return pooled[:, :, 0] @ params["cls_w"].T


# -------------------------- pure-JAX reference ------------------------------ #

def ref_forward(x_nchw, params, with_cam=False, compute_dtype=jnp.bfloat16):
    """Reference with the same operand quantization as the kernel (f32 accum)."""
    N, Cin, H, W = x_nchw.shape
    HW = H * W
    K = params["num_classes"]
    f32 = jnp.float32

    xq = x_nchw.reshape(N, Cin, HW).astype(compute_dtype).astype(f32)
    wq = ((params["stage_w"] * params["bn_scale"][None, :]).T
          .astype(compute_dtype).astype(f32))                           # (Cf, Cin)
    shift = params["bn_shift"].reshape(1, -1, 1).astype(f32)

    y = jnp.einsum("fc,ncl->nfl", wq, xq, precision="highest") + shift
    y = jnp.maximum(y, 0.0)                                             # (N, Cf, HW)

    cls_w = params["cls_w"]
    if with_cam:
        cq = cls_w.astype(compute_dtype).astype(f32)
        yq = y.astype(compute_dtype).astype(f32)
        f = jnp.einsum("kf,nfl->nkl", cq, yq, precision="highest")      # (N, K, HW)
        logits = jnp.mean(f, axis=-1)
        return logits, f.reshape(N, K, H, W)
    else:
        pooled = jnp.mean(y, axis=-1)                                   # (N, Cf)
        return pooled @ cls_w.T


# ---------------------------------- main ------------------------------------ #

if __name__ == "__main__":
    key = jax.random.PRNGKey(0)
    N, Cin, H, W = 2, 4, 16, 16          # small test input (PyTorch NCHW)
    num_features = 32                    # real backbone uses 2048
    num_classes = 20
    eps = 1e-5

    k_x, k_w, k_g, k_b, k_m, k_v, k_c = jax.random.split(key, 7)
    x_nchw = jax.random.normal(k_x, (N, Cin, H, W), dtype=jnp.float32)

    # synthetic backbone-stage parameters (1x1 conv + FixedBatchNorm inference)
    stage_w = jax.random.normal(k_w, (Cin, num_features), jnp.float32) * 0.1
    gamma = 1.0 + 0.1 * jax.random.normal(k_g, (num_features,), jnp.float32)
    beta = 0.1 * jax.random.normal(k_b, (num_features,), jnp.float32)
    running_mean = 0.1 * jax.random.normal(k_m, (num_features,), jnp.float32)
    running_var = jnp.abs(1.0 + 0.1 * jax.random.normal(k_v, (num_features,),
                                                        jnp.float32))
    inv_std = 1.0 / jnp.sqrt(running_var + eps)
    bn_scale = gamma * inv_std
    bn_shift = beta - running_mean * gamma * inv_std

    # classifier = nn.Conv2d(num_features, num_classes, 1, bias=False)
    cls_w = jax.random.normal(k_c, (num_classes, num_features), jnp.float32) * 0.05

    params = dict(stage_w=stage_w, bn_scale=bn_scale, bn_shift=bn_shift,
                  cls_w=cls_w, num_classes=num_classes)

    # --- f32 run: tight structural check (hw_tile=128 -> 2 reduction steps) ---
    lg = classifier_forward(x_nchw, params, with_cam=False, hw_tile=128,
                            compute_dtype=jnp.float32)
    lg_cam, feats = classifier_forward(x_nchw, params, with_cam=True, hw_tile=128,
                                       compute_dtype=jnp.float32)
    jax.block_until_ready((lg, lg_cam, feats))
    lg_r = ref_forward(x_nchw, params, with_cam=False, compute_dtype=jnp.float32)
    lg_cam_r, feats_r = ref_forward(x_nchw, params, with_cam=True,
                                    compute_dtype=jnp.float32)
    assert lg.shape == (N, num_classes)
    assert lg_cam.shape == (N, num_classes)
    assert feats.shape == (N, num_classes, H, W)
    assert jnp.allclose(lg, lg_r, atol=1e-4, rtol=1e-4)
    assert jnp.allclose(lg_cam, lg_cam_r, atol=1e-4, rtol=1e-4)
    assert jnp.allclose(feats, feats_r, atol=1e-4, rtol=1e-4)

    # --- bf16 run (production path: bf16 MXU operands, f32 accumulation) ---
    lgb = classifier_forward(x_nchw, params, with_cam=False, hw_tile=128)
    lgb_cam, featsb = classifier_forward(x_nchw, params, with_cam=True, hw_tile=128)
    jax.block_until_ready((lgb, lgb_cam, featsb))
    lgb_r = ref_forward(x_nchw, params, with_cam=False)
    lgb_cam_r, featsb_r = ref_forward(x_nchw, params, with_cam=True)
    assert jnp.allclose(lgb, lgb_r, atol=1e-3, rtol=1e-2)
    assert jnp.allclose(lgb_cam, lgb_cam_r, atol=1e-3, rtol=1e-2)
    assert jnp.allclose(featsb, featsb_r, atol=1e-3, rtol=1e-2)

    print("KERNEL_OK")
</pallas_src>

<mosaic_0001>
module attributes {stable_mosaic.version = 11 : i64} {
  func.func @_stage_gap_kernel(%arg0: i32, %arg1: i32, %arg2: memref<1x4x128xf32, #tpu.memory_space<vmem>>, %arg3: memref<32x4xf32, #tpu.memory_space<vmem>>, %arg4: memref<32x1xf32, #tpu.memory_space<vmem>>, %arg5: memref<1x32x1xf32, #tpu.memory_space<vmem>>, %arg6: memref<32x1xf32, #tpu.memory_space<vmem>>) attributes {dimension_semantics = [#tpu.dimension_semantics<parallel>, #tpu.dimension_semantics<arbitrary>], iteration_bounds = array<i64: 2, 2>, scalar_prefetch = 0 : i64, scratch_operands = 1 : i64, tpu.core_type = #tpu.core_type<tc>, window_params = [{transform_indices = @transform_0, window_bounds = array<i64: 1, 4, 128>}, {pipeline_mode = #tpu.pipeline_mode<synchronous>, transform_indices = @transform_1, window_bounds = array<i64: 32, 4>}, {pipeline_mode = #tpu.pipeline_mode<synchronous>, transform_indices = @transform_2, window_bounds = array<i64: 32, 1>}, {transform_indices = @transform_3, window_bounds = array<i64: 1, 32, 1>}]} {
    %c0_i32 = arith.constant 0 : i32
    %0 = arith.cmpi eq, %arg1, %c0_i32 : i32
    %1 = arith.extui %0 : i1 to i32
    %c0_i32_0 = arith.constant 0 : i32
    %2 = arith.cmpi ne, %1, %c0_i32_0 : i32
    scf.if %2 {
      %cst_14 = arith.constant 0.000000e+00 : f32
      %20 = vector.broadcast %cst_14 : f32 to vector<32x1xf32>
      %c0_15 = arith.constant 0 : index
      %c0_16 = arith.constant 0 : index
      %21 = vector.load %arg6[%c0_15, %c0_16] : memref<32x1xf32, #tpu.memory_space<vmem>>, vector<32x1xf32>
      tpu.vector_store %arg6[%c0_15, %c0_16], %20 {strides = array<i32>} : memref<32x1xf32, #tpu.memory_space<vmem>>, vector<32x1xf32>,
    } else {
    }
    %c0 = arith.constant 0 : index
    %c0_1 = arith.constant 0 : index
    %c0_2 = arith.constant 0 : index
    %3 = vector.load %arg2[%c0, %c0_1, %c0_2] : memref<1x4x128xf32, #tpu.memory_space<vmem>>, vector<1x4x128xf32>
    %4 = vector.shape_cast %3 : vector<1x4x128xf32> to vector<4x128xf32>
    %c0_3 = arith.constant 0 : index
    %c0_4 = arith.constant 0 : index
    %5 = vector.load %arg3[%c0_3, %c0_4] : memref<32x4xf32, #tpu.memory_space<vmem>>, vector<32x4xf32>
    %cst = arith.constant dense<0.000000e+00> : vector<32x128xf32>
    %6 = tpu.matmul %5, %4, %cst {dimension_numbers = #tpu.dot_dimension_numbers<[1], [0], [0], [1], [0, 0, 1, 1], [], []>} : vector<32x4xf32>, vector<4x128xf32>, vector<32x128xf32> -> vector<32x128xf32>
    %c0_5 = arith.constant 0 : index
    %c0_6 = arith.constant 0 : index
    %7 = vector.load %arg4[%c0_5, %c0_6] : memref<32x1xf32, #tpu.memory_space<vmem>>, vector<32x1xf32>
    %8 = vector.broadcast %7 : vector<32x1xf32> to vector<32x128xf32>
    %9 = arith.addf %6, %8 : vector<32x128xf32>
    %cst_7 = arith.constant 0.000000e+00 : f32
    %10 = vector.broadcast %cst_7 : f32 to vector<32x128xf32>
    %11 = arith.maximumf %9, %10 : vector<32x128xf32>
    %c0_8 = arith.constant 0 : index
    %c0_9 = arith.constant 0 : index
    %12 = vector.load %arg6[%c0_8, %c0_9] : memref<32x1xf32, #tpu.memory_space<vmem>>, vector<32x1xf32>
    %cst_10 = arith.constant dense<0.000000e+00> : vector<32xf32>
    %13 = vector.multi_reduction <add>, %11, %cst_10 [1] : vector<32x128xf32> to vector<32xf32>
    %14 = vector.shape_cast %13 : vector<32xf32> to vector<32x1xf32>
    %15 = arith.addf %12, %14 : vector<32x1xf32>
    %c0_11 = arith.constant 0 : index
    %c0_12 = arith.constant 0 : index
    %16 = vector.load %arg6[%c0_11, %c0_12] : memref<32x1xf32, #tpu.memory_space<vmem>>, vector<32x1xf32>
    tpu.vector_store %arg6[%c0_11, %c0_12], %15 {strides = array<i32>} : memref<32x1xf32, #tpu.memory_space<vmem>>, vector<32x1xf32>,
    %c1_i32 = arith.constant 1 : i32
    %17 = arith.cmpi eq, %arg1, %c1_i32 : i32
    %18 = arith.extui %17 : i1 to i32
    %c0_i32_13 = arith.constant 0 : i32
    %19 = arith.cmpi ne, %18, %c0_i32_13 : i32
    scf.if %19 {
      %c0_14 = arith.constant 0 : index
      %c0_15 = arith.constant 0 : index
      %20 = vector.load %arg6[%c0_14, %c0_15] : memref<32x1xf32, #tpu.memory_space<vmem>>, vector<32x1xf32>
      %cst_16 = arith.constant 3.906250e-03 : f32
      %21 = vector.broadcast %cst_16 : f32 to vector<32x1xf32>
      %22 = arith.mulf %20, %21 : vector<32x1xf32>
      %c0_17 = arith.constant 0 : index
      %c0_18 = arith.constant 0 : index
      %c0_19 = arith.constant 0 : index
      %23 = vector.load %arg5[%c0_17, %c0_18, %c0_19] : memref<1x32x1xf32, #tpu.memory_space<vmem>>, vector<1x32x1xf32>
      %24 = vector.shape_cast %23 : vector<1x32x1xf32> to vector<32x1xf32>
      %25 = vector.shape_cast %22 : vector<32x1xf32> to vector<1x32x1xf32>
      tpu.vector_store %arg5[%c0_17, %c0_18, %c0_19], %25 {strides = array<i32>} : memref<1x32x1xf32, #tpu.memory_space<vmem>>, vector<1x32x1xf32>,
    } else {
    }
    return
  }
  func.func @transform_0(%arg0: i32, %arg1: i32) -> (i32, i32, i32) {
    %c0_i32 = arith.constant 0 : i32
    %c0_i32_0 = arith.constant 0 : i32
    return %arg0, %c0_i32, %arg1 : i32, i32, i32
  }
  func.func @transform_1(%arg0: i32, %arg1: i32) -> (i32, i32) {
    %c0_i32 = arith.constant 0 : i32
    %c0_i32_0 = arith.constant 0 : i32
    %c0_i32_1 = arith.constant 0 : i32
    return %c0_i32, %c0_i32_0 : i32, i32
  }
  func.func @transform_2(%arg0: i32, %arg1: i32) -> (i32, i32) {
    %c0_i32 = arith.constant 0 : i32
    %c0_i32_0 = arith.constant 0 : i32
    %c0_i32_1 = arith.constant 0 : i32
    return %c0_i32, %c0_i32_0 : i32, i32
  }
  func.func @transform_3(%arg0: i32, %arg1: i32) -> (i32, i32, i32) {
    %c0_i32 = arith.constant 0 : i32
    %c0_i32_0 = arith.constant 0 : i32
    %c0_i32_1 = arith.constant 0 : i32
    return %arg0, %c0_i32, %c0_i32_0 : i32, i32, i32
  }
}

</mosaic_0001>

<bundles_post_ra>
// kernel: tpu_custom_call.1
= control target key start
LH: loop header
LB: loop body
LE: loop exit
PB: predicated region body
PF: predicated region fallthrough
CT: control target
= control target key end

     0   :  { %s587_s12 = smov 0   ;;  %s589_s13 = smov 0   ;;  %s682_s0 = inlined_call_operand.vmem [shape: f32[2,4,256], index: 0, kind: input, shape index: {}]   ;;  %s683_s1 = inlined_call_operand.vmem [shape: f32[32,4], index: 1, kind: input, shape index: {}]   ;;  %s684_s2 = inlined_call_operand.vmem [shape: f32[32,1], index: 2, kind: input, shape index: {}]   ;;  %s685_s3 = inlined_call_operand.vmem [shape: f32[2,32,1], index: 3, kind: output, shape index: {}]  }
   0x1   :  { %s591_s14 = smov 0   ;;  %s593_s15 = smov 0  }
   0x2   :  { %s595_s16 = smov 0  }
   0x3 LB: > { %s22_s17 = sadd.s32 1, %s555_s14  ;;  %s25_s18 = sadd.s32 1, %s559_s15  ;;  %s563_s16 = sphi %s595_s16, %s13_s16   ;;  %s559_s15 = sphi %s593_s15, %s689_s15   ;;  %s555_s14 = sphi %s591_s14, %s688_s14   ;;  %s551_s13 = sphi %s589_s13, %s687_s13   ;;  %s547_s12 = sphi %s587_s12, %s686_s12  }
   0x4   : > { %p23_p0 = scmp.ge.s32.totalorder %s22_s17, 2  ;;  %p451_p1 = scmp.ge.s32.totalorder %s563_s16, 1 }
   0x5   : > { %p154_p2 = scmp.lt.s32.totalorder %s563_s16, 5 }
   0x6   : > { %s691_s17 = smov (%p23_p0, %s22_s17), 0  ;;  %s693_s18 = smov (!%p23_p0, %s25_s18), %s559_s15 }
   0x7   : > { %p155_p3 = pnand %p451_p1, %p154_p2  ;;  %p27_p4 = scmp.ge.s32.totalorder %s693_s18, 2 }
   0x8   : > { %p181_p5 = scmp.lt.s32.totalorder (!%p155_p3), %s551_s13, 1  ;;  %p183_p6 = scmp.lt.s32.totalorder (!%p155_p3), %s547_s12, 1 }
   0x9   : > { %s695_s18 = smov (%p27_p4, %s693_s18), 0  ;;  %158 = sbr.rel (%p155_p3) target bundleno = 387 (0x183), region = 32 }
   0xa   : > { %p456_p7 = scmp.ne.s32.totalorder (!%p155_p3), %s547_s12, 0 }
   0xe   : > { %s697_s13 = smov (!%p181_p5, %s551_s13), 1 }
   0xf   : > { %s184_s19 = scalar_select %p183_p6, %s547_s12, 1 }
  0x10   : > { %s452_s20 = sshll.u32 %s697_s13, 1  ;;  %s465_s21 = sshll.u32 %s697_s13, 5 }
  0x11   : > { %s186_s22 = sadd.s32 %s452_s20, %s184_s19  ;;  %s624_s25 = scalar_lea.vmem %s685_s3, %s465_s21 }
  0x12   : > { %s453_s26 = sshll.u32 %s186_s22, 2  ;;  %197 = sbr.rel (%p456_p7) target bundleno = 26 (0x1a), region = 36 }
  0x13   : > { %s188_s29 = scalar_lea.vmem %s682_s0, %s453_s26 }
  0x17   : > { %vm198_vm0 = vcmask 7168   ;;  %v565_v0 = vmov 0.0  }
  0x18   : > { %199 = vst.msk [vmem:[#allocation2] sm:$0xff] %vm198_vm0, %v565_v0  ;;  %200 = vst.msk [vmem:[#allocation2 + $0x8] sm:$0xff] %vm198_vm0, %v565_v0 }
  0x19   : > { %201 = vst.msk [vmem:[#allocation2 + $0x10] sm:$0xff] %vm198_vm0, %v565_v0  ;;  %202 = vst.msk [vmem:[#allocation2 + $0x18] sm:$0xff] %vm198_vm0, %v565_v0 }
  0x1a PF: > { %v203_v1 = vld [vmem:[%s188_s29] sm:$0xf]  ;;  %vm245_vm1 = vcmask 1043456   ;;  %vm232_vm2 = vcmask 31744   ;;  %v205_v3 = vld [vmem:[%s683_s1 + $0x8] sm:$0xff]  ;;  %v206_v4 = vld [vmem:[%s683_s1 + $0x10] sm:$0xff] }
  0x1b   : > { %v204_v2 = vld [vmem:[%s683_s1] sm:$0xff]  ;;  %471 = vmatprep.subr.msk.mxu0 %vm245_vm1, %v203_v1  ;;  %479 = vmatprep.subr.msk.mxu1 %vm245_vm1, %v203_v1  ;;  %v207_v5 = vld [vmem:[%s683_s1 + $0x18] sm:$0xff]  ;;  %v566_v7 = vmov 0   ;;  %v210_v8 = vld [vmem:[%s684_s2 + $0x10] sm:$0xff]  ;;  %vm354_vm3 = vcmask 7168   ;;  %p462_p8 = scmp.ne.s32.totalorder %s547_s12, 1 }
  0x1c   : > { %473 = vmatprep.mubr.msk.f32.mxu0 %vm232_vm2, %v204_v2  ;;  %472 = vmatpush3.msk.msra.mxu0 %vm245_vm1, %v203_v1  ;;  %v208_v6 = vld [vmem:[%s684_s2] sm:$0xff]  ;;  %v209_v9 = vld [vmem:[%s684_s2 + $0x8] sm:$0xff]  ;;  %v211_v10 = vld [vmem:[%s684_s2 + $0x18] sm:$0xff] }
  0x1d   : > { %474 = vmatmul.mubr.msk.f32.vlgmr.msra.gmra.mxu0 %vm232_vm2, %v205_v3  ;;  %480 = vmatpush3.msk.msra.mxu1 %vm245_vm1, %v203_v1 }
  0x1e   : > { %476 = vmatprep.mubr.msk.f32.mxu1 %vm232_vm2, %v206_v4  ;;  %523 = vset.pattern.permute.xlu0 %v566_v7 }
  0x1f   : > { %477 = vmatmul.mubr.msk.f32.vlgmr.msra.gmra.mxu1 %vm232_vm2, %v207_v5  ;;  %214 = vperm.xlu0 %523, %v208_v6   ;;  %v339_v27 = vld [vmem:[#allocation2 + $0x8] sm:$0xff]  ;;  %v338_v29 = vld [vmem:[#allocation2] sm:$0xff] }
  0x20   : > { %524 = vset.pattern.permute.xlu1 %v566_v7  ;;  %v340_v33 = vld [vmem:[#allocation2 + $0x10] sm:$0xff]  ;;  %v341_v36 = vld [vmem:[#allocation2 + $0x18] sm:$0xff] }
  0x21   : > { %224 = vperm.xlu1 %524, %v210_v8  }
  0x23   : > { %219 = vperm.xlu0 %523, %v209_v9  }
  0x25   : > { %229 = vperm.xlu1 %524, %v211_v10  }
  0x9a   : > { %v215_v11 = vpop.permute.xlu0 %214 }
  0x9c   : > { %v225_v13 = vpop.permute.xlu1 %224 }
  0x9e   : > { %v220_v12 = vpop.permute.xlu0 %219 }
  0xa0   : > { %v230_v23 = vpop.permute.xlu1 %229 }
  0xdd   : > { %v475_v14 = vpop.f32.mrf.mxu0 }
  0xde   : > { %v321_v15 = vadd.f32 %v475_v14, %v220_v12 }
  0xdf   : > { %v315_v16 = vpop.f32.mrf.mxu0  ;;  %v478_v17 = vpop.f32.mrf.mxu1 }
  0xe0   : > { %v335_v18 = vmax.f32 %v321_v15, 0.0  ;;  %v316_v19 = vadd.f32 %v315_v16, %v215_v11  ;;  %v331_v24 = vadd.f32 %v478_v17, %v230_v23 }
  0xe1   : > { %v325_v20 = vpop.f32.mrf.mxu1 }
  0xe2   : > { %v334_v21 = vmax.f32 %v316_v19, 0.0  ;;  %v326_v22 = vadd.f32 %v325_v20, %v225_v13  ;;  %344 = vadd.xlane.f32.xlu1 %v335_v18  ;;  %v337_v26 = vmax.f32 %v331_v24, 0.0 }
  0xe4   : > { %342 = vadd.xlane.f32.xlu0 %v334_v21  ;;  %v336_v25 = vmax.f32 %v326_v22, 0.0 }
  0xe8   : > { %346 = vadd.xlane.f32.xlu0 %v336_v25 }
  0xec   : > { %348 = vadd.xlane.f32.xlu0 %v337_v26 }
 0x16b   : > { %v345_v28 = vpop.xlane.xlu1 %344 }
 0x16c   : > { %v351_v30 = vadd.f32 %v345_v28, %v339_v27 }
 0x16d   : > { %v343_v31 = vpop.xlane.xlu0 %342 }
 0x16e   : > { %356 = vst.msk [vmem:[#allocation2 + $0x8] sm:$0xff] %vm354_vm3, %v351_v30  ;;  %v350_v32 = vadd.f32 %v343_v31, %v338_v29 }
 0x170   : > { %355 = vst.msk [vmem:[#allocation2] sm:$0xff] %vm354_vm3, %v350_v32 }
 0x171   : > { %v347_v34 = vpop.xlane.xlu0 %346 }
 0x172   : > { %v352_v35 = vadd.f32 %v347_v34, %v340_v33 }
 0x174   : > { %357 = vst.msk [vmem:[#allocation2 + $0x10] sm:$0xff] %vm354_vm3, %v352_v35  ;;  %362 = sbr.rel (%p462_p8) target bundleno = 387 (0x183), region = 40 }
 0x175   : > { %v349_v37 = vpop.xlane.xlu0 %348 }
 0x176   : > { %v353_v38 = vadd.f32 %v349_v37, %v341_v36 }
 0x178   : > { %358 = vst.msk [vmem:[#allocation2 + $0x18] sm:$0xff] %vm354_vm3, %v353_v38 }
 0x179   : > { %v363_v39 = vld [vmem:[#allocation2] sm:$0xff]  ;;  %v364_v40 = vld [vmem:[#allocation2 + $0x8] sm:$0xff] }
 0x17a   : > { %v367_v42 = vmul.f32 0.00390625, %v363_v39  ;;  %v368_v43 = vmul.f32 0.00390625, %v364_v40 }
 0x17b   : > { %v365_v41 = vld [vmem:[#allocation2 + $0x10] sm:$0xff] }
 0x17c   : > { %v369_v44 = vmul.f32 0.00390625, %v365_v41  ;;  %371 = vst.msk [vmem:[%s624_s25] sm:$0xff] %vm354_vm3, %v367_v42  ;;  %372 = vst.msk [vmem:[%s624_s25 + $0x8] sm:$0xff] %vm354_vm3, %v368_v43 }
 0x17e   : > { %373 = vst.msk [vmem:[%s624_s25 + $0x10] sm:$0xff] %vm354_vm3, %v369_v44 }
 0x17f   : > { %v366_v45 = vld [vmem:[#allocation2 + $0x18] sm:$0xff] }
 0x180   : > { %v370_v46 = vmul.f32 0.00390625, %v366_v45 }
 0x182   : > { %374 = vst.msk [vmem:[%s624_s25 + $0x18] sm:$0xff] %vm354_vm3, %v370_v46 }
 0x183 PF: > { %s13_s16 = sadd.s32 1, %s563_s16   ;;  %s686_s12 = smov %s555_s14 }
 0x184   : > { %p10_p9 = scmp.ge.s32.totalorder %s13_s16, 6   ;;  %s687_s13 = smov %s559_s15 }
 0x185   : > { %s688_s14 = smov %s691_s17  ;;  %s689_s15 = smov %s695_s18 }
 0x186   :  { %12 = sbr.rel (!%p10_p9) target bundleno = 3 (0x3), region = 70 }

</bundles_post_ra>
